<compile_context>
chip_gen: v6e
topology: v6e:2x2x1
jax: 0.10.0
libtpu: 0.0.40
codegen_flags: <defaults>
</compile_context>

<pallas_src>
import functools

import jax
import jax.numpy as jnp
from jax.experimental import pallas as pl
from jax.experimental.pallas import tpu as pltpu

LANE = 128
SUBLANE = 8
TARGET_TILE_BYTES = 1 << 20      # ~1 MiB per input DMA (near HBM-roofline tile)


def _default_ncores():
    """2 TensorCores only on v7x; single-TC elsewhere (extra axis = serial loop)."""
    try:
        kind = jax.devices()[0].device_kind.lower()
    except Exception:
        return 1
    return 2 if ("v7" in kind or "7x" in kind) else 1


def homo_loss_kernel(x_ref, o_ref, acc_ref, *, tile_rows, tiles_per_core, rows,
                     needs_mask):
    c = pl.program_id(0)          # per-core (parallel) axis
    i = pl.program_id(1)          # reduction (arbitrary) axis

    @pl.when(i == 0)
    def _():
        acc_ref[...] = jnp.zeros_like(acc_ref)

    x = x_ref[...].astype(jnp.float32)
    # x^2 (x < 0.5) else (x-1)^2  ==  t*t with t = x or (x - 1): 3 VPU ops/elem.
    t = jnp.where(x >= 0.5, x - 1.0, x)
    sq = t * t

    if tile_rows % SUBLANE == 0:
        # Fold (tile_rows, 128) into the (8, 128) accumulator: pure VPU adds.
        def fold(v):
            return jnp.sum(v.reshape(-1, SUBLANE, LANE), axis=0)
    else:
        # Tiny single-tile case (tile_rows == rows < 8): (1, 128) accumulator.
        def fold(v):
            return jnp.sum(v, axis=0, keepdims=True)

    if needs_mask:
        # Only the last real tile (and the <=1 clamped duplicate per core) has
        # invalid rows; gate masking behind pl.when so interior tiles pay zero
        # masking cost and the iota/select runs on at most 2 steps per core.
        valid_rows = rows - (c * tiles_per_core + i) * tile_rows
        is_full = valid_rows >= tile_rows

        @pl.when(is_full)
        def _():
            acc_ref[...] += fold(sq)

        @pl.when(jnp.logical_not(is_full))
        def _():
            # Partial-block padding data is unspecified: zero it before folding.
            row_idx = jax.lax.broadcasted_iota(jnp.int32, (tile_rows, 1), 0)
            acc_ref[...] += fold(jnp.where(row_idx < valid_rows, sq, 0.0))
    else:
        acc_ref[...] += fold(sq)

    @pl.when(i == pl.num_programs(1) - 1)
    def _():
        o_ref[0, 0] = jnp.sum(acc_ref[...])


def homo_loss(x, *, tile_rows_max=None, ncores=None):
    """Scalar HomoLoss over an arbitrarily-shaped float input."""
    flat = x.reshape(-1)                       # free; keeps original dtype
    n = flat.shape[0]
    itemsize = jnp.dtype(x.dtype).itemsize
    row_align = max(SUBLANE, 32 // itemsize)   # 8 rows f32, 16 rows bf16

    if n % LANE != 0:
        # TODO(synk): rare ragged-lane fallback (numel % 128 != 0) still pads
        # (full-array copy); a fully padless path needs a manual 1-D DMA tail.
        flat = jnp.pad(flat, (0, (-n) % LANE))  # zeros contribute 0^2 = 0
    x2d = flat.reshape(-1, LANE)               # free, lane-aligned view
    rows = x2d.shape[0]

    if tile_rows_max is None:
        tile_rows_max = max(row_align, TARGET_TILE_BYTES // (LANE * itemsize))

    if rows <= tile_rows_max:
        tile_rows = rows                       # full extent: always legal
    else:
        tile_rows = max(row_align, (tile_rows_max // row_align) * row_align)
    tiles_total = pl.cdiv(rows, tile_rows)

    nc = max(1, min(ncores if ncores is not None else _default_ncores(),
                    tiles_total))
    tiles_per_core = pl.cdiv(tiles_total, nc)
    clamped = nc * tiles_per_core != tiles_total
    needs_mask = (rows % tile_rows != 0) or clamped

    if clamped:
        # Steps past the last real tile re-fetch it; they are fully masked.
        def in_map(c, i):
            return (jnp.minimum(c * tiles_per_core + i, tiles_total - 1), 0)
    else:
        def in_map(c, i):
            return (c * tiles_per_core + i, 0)

    in_spec = pl.BlockSpec((tile_rows, LANE), in_map)
    if nc >= 2 and hasattr(pl, "Buffered"):
        # v7x: deepen the input pipeline so each TC's DMA queue stays full.
        try:
            in_spec = pl.BlockSpec((tile_rows, LANE), in_map,
                                   pipeline_mode=pl.Buffered(3))
        except TypeError:
            pass  # older JAX without pipeline_mode: default double-buffering

    acc_rows = SUBLANE if tile_rows % SUBLANE == 0 else 1

    kernel = functools.partial(
        homo_loss_kernel, tile_rows=tile_rows, tiles_per_core=tiles_per_core,
        rows=rows, needs_mask=needs_mask)

    # TODO(synk): on v7x, sweep dimension_semantics=(pltpu.CORE_PARALLEL,
    # pltpu.ARBITRARY) and confirm the 2-TC split in an xprof trace.
    partial_sums = pl.pallas_call(
        kernel,
        out_shape=jax.ShapeDtypeStruct((nc, 1), jnp.float32),
        grid_spec=pltpu.PrefetchScalarGridSpec(
            num_scalar_prefetch=0,
            grid=(nc, tiles_per_core),
            in_specs=[in_spec],
            out_specs=pl.BlockSpec((1, 1), lambda c, i: (c, 0),
                                   memory_space=pltpu.SMEM),
            scratch_shapes=[pltpu.VMEM((acc_rows, LANE), jnp.float32)],
        ),
        compiler_params=pltpu.CompilerParams(
            dimension_semantics=("parallel", "arbitrary")),
    )(x2d)
    return jnp.sum(partial_sums)


def _ref(x):
    xf = x.astype(jnp.float32)
    return jnp.sum(jnp.where(xf < 0.5, xf ** 2, (xf - 1.0) ** 2))


if __name__ == "__main__":
    keys = jax.random.split(jax.random.PRNGKey(0), 6)

    # Primary check: small NCHW input (single full-extent tile, no mask/pad).
    x = jax.random.uniform(keys[0], (2, 4, 16, 16), dtype=jnp.float32)
    loss = jax.block_until_ready(homo_loss(x))
    assert jnp.allclose(loss, _ref(x), rtol=1e-5, atol=1e-3), (loss, _ref(x))

    # Multi-step reduction + masked partial last tile (56 rows, 16-row tiles).
    x2 = jax.random.uniform(keys[1], (2, 4, 28, 32), dtype=jnp.float32)
    loss2 = jax.block_until_ready(homo_loss(x2, tile_rows_max=16))
    assert jnp.allclose(loss2, _ref(x2), rtol=1e-5, atol=1e-3), (loss2, _ref(x2))

    # Ragged row count handled without any padding (9 rows, 8-row tiles ->
    # 1 valid row in the last partial block, masked in-kernel).
    x3 = jax.random.uniform(keys[2], (2, 2, 9, 32), dtype=jnp.float32)
    loss3 = jax.block_until_ready(homo_loss(x3, tile_rows_max=8))
    assert jnp.allclose(loss3, _ref(x3), rtol=1e-5, atol=1e-3), (loss3, _ref(x3))

    # bf16 input stays 2 B/elem through the DMA; cast to f32 happens in-kernel.
    xb = jax.random.uniform(keys[3], (2, 2, 16, 32),
                            dtype=jnp.float32).astype(jnp.bfloat16)
    loss4 = jax.block_until_ready(homo_loss(xb))
    assert jnp.allclose(loss4, _ref(xb), rtol=1e-5, atol=1e-3), (loss4, _ref(xb))

    # Ragged-lane fallback path (numel % 128 != 0 -> small tail pad only).
    x5 = jax.random.uniform(keys[4], (2, 4, 7, 9), dtype=jnp.float32)
    loss5 = jax.block_until_ready(homo_loss(x5))
    assert jnp.allclose(loss5, _ref(x5), rtol=1e-5, atol=1e-3), (loss5, _ref(x5))

    # Larger input: default path (one ~1 MiB tile) and an explicit 2-way
    # core-split / multi-tile streaming path (as used on v7x).
    x6 = jax.random.uniform(keys[5], (8, 8, 64, 64), dtype=jnp.float32)
    loss6a = jax.block_until_ready(homo_loss(x6))
    loss6b = jax.block_until_ready(homo_loss(x6, ncores=2, tile_rows_max=512))
    assert jnp.allclose(loss6a, _ref(x6), rtol=1e-5, atol=1e-2), (loss6a, _ref(x6))
    assert jnp.allclose(loss6b, _ref(x6), rtol=1e-5, atol=1e-2), (loss6b, _ref(x6))

    print("KERNEL_OK")
</pallas_src>

<mosaic_0001>
module attributes {stable_mosaic.version = 11 : i64} {
  func.func @homo_loss_kernel(%arg0: i32, %arg1: i32, %arg2: memref<16x128xf32, #tpu.memory_space<vmem>>, %arg3: memref<1x1xf32, #tpu.memory_space<smem>>, %arg4: memref<8x128xf32, #tpu.memory_space<vmem>>) attributes {dimension_semantics = [#tpu.dimension_semantics<parallel>, #tpu.dimension_semantics<arbitrary>], iteration_bounds = array<i64: 1, 1>, scalar_prefetch = 0 : i64, scratch_operands = 1 : i64, tpu.core_type = #tpu.core_type<tc>, window_params = [{transform_indices = @transform_0, window_bounds = array<i64: 16, 128>}, {transform_indices = @transform_1, window_bounds = array<i64: 1, 1>}]} {
    %c0_i32 = arith.constant 0 : i32
    %0 = arith.cmpi eq, %arg1, %c0_i32 : i32
    %1 = arith.extui %0 : i1 to i32
    %c0_i32_0 = arith.constant 0 : i32
    %2 = arith.cmpi ne, %1, %c0_i32_0 : i32
    scf.if %2 {
      %cst_10 = arith.constant 0.000000e+00 : f32
      %18 = vector.broadcast %cst_10 : f32 to vector<8x128xf32>
      %c0_11 = arith.constant 0 : index
      %c0_12 = arith.constant 0 : index
      %19 = vector.load %arg4[%c0_11, %c0_12] : memref<8x128xf32, #tpu.memory_space<vmem>>, vector<8x128xf32>
      tpu.vector_store %arg4[%c0_11, %c0_12], %18 {strides = array<i32>} : memref<8x128xf32, #tpu.memory_space<vmem>>, vector<8x128xf32>,
    } else {
    }
    %c0 = arith.constant 0 : index
    %c0_1 = arith.constant 0 : index
    %3 = vector.load %arg2[%c0, %c0_1] : memref<16x128xf32, #tpu.memory_space<vmem>>, vector<16x128xf32>
    %cst = arith.constant 5.000000e-01 : f32
    %4 = vector.broadcast %cst : f32 to vector<16x128xf32>
    %5 = arith.cmpf oge, %3, %4 : vector<16x128xf32>
    %cst_2 = arith.constant 1.000000e+00 : f32
    %6 = vector.broadcast %cst_2 : f32 to vector<16x128xf32>
    %7 = arith.subf %3, %6 : vector<16x128xf32>
    %8 = arith.select %5, %7, %3 : vector<16x128xi1>, vector<16x128xf32>
    %9 = arith.mulf %8, %8 : vector<16x128xf32>
    %c0_3 = arith.constant 0 : index
    %c0_4 = arith.constant 0 : index
    %10 = vector.load %arg4[%c0_3, %c0_4] : memref<8x128xf32, #tpu.memory_space<vmem>>, vector<8x128xf32>
    %11 = vector.shape_cast %9 : vector<16x128xf32> to vector<2x8x128xf32>
    %cst_5 = arith.constant dense<0.000000e+00> : vector<8x128xf32>
    %12 = vector.multi_reduction <add>, %11, %cst_5 [0] : vector<2x8x128xf32> to vector<8x128xf32>
    %13 = arith.addf %10, %12 : vector<8x128xf32>
    %c0_6 = arith.constant 0 : index
    %c0_7 = arith.constant 0 : index
    %14 = vector.load %arg4[%c0_6, %c0_7] : memref<8x128xf32, #tpu.memory_space<vmem>>, vector<8x128xf32>
    tpu.vector_store %arg4[%c0_6, %c0_7], %13 {strides = array<i32>} : memref<8x128xf32, #tpu.memory_space<vmem>>, vector<8x128xf32>,
    %c0_i32_8 = arith.constant 0 : i32
    %15 = arith.cmpi eq, %arg1, %c0_i32_8 : i32
    %16 = arith.extui %15 : i1 to i32
    %c0_i32_9 = arith.constant 0 : i32
    %17 = arith.cmpi ne, %16, %c0_i32_9 : i32
    scf.if %17 {
      %c0_10 = arith.constant 0 : index
      %c0_11 = arith.constant 0 : index
      %18 = vector.load %arg4[%c0_10, %c0_11] : memref<8x128xf32, #tpu.memory_space<vmem>>, vector<8x128xf32>
      %19 = vector.shape_cast %18 : vector<8x128xf32> to vector<1x8x128xf32>
      %cst_12 = arith.constant dense<0.000000e+00> : vector<1xf32>
      %20 = vector.multi_reduction <add>, %19, %cst_12 [1, 2] : vector<1x8x128xf32> to vector<1xf32>
      %21 = vector.shape_cast %20 : vector<1xf32> to vector<1x1x1xf32>
      %22 = vector.extract %21[0, 0, 0] : f32 from vector<1x1x1xf32>
      %c0_13 = arith.constant 0 : index
      %c0_14 = arith.constant 0 : index
      %23 = memref.load %arg3[%c0_13, %c0_14] : memref<1x1xf32, #tpu.memory_space<smem>>
      memref.store %22, %arg3[%c0_13, %c0_14] : memref<1x1xf32, #tpu.memory_space<smem>>
    } else {
    }
    return
  }
  func.func @transform_0(%arg0: i32, %arg1: i32) -> (i32, i32) {
    %c1_i32 = arith.constant 1 : i32
    %0 = arith.muli %arg0, %c1_i32 : i32
    %1 = arith.addi %0, %arg1 : i32
    %c0_i32 = arith.constant 0 : i32
    %c0_i32_0 = arith.constant 0 : i32
    return %1, %c0_i32 : i32, i32
  }
  func.func @transform_1(%arg0: i32, %arg1: i32) -> (i32, i32) {
    %c0_i32 = arith.constant 0 : i32
    %c0_i32_0 = arith.constant 0 : i32
    return %arg0, %c0_i32 : i32, i32
  }
}

</mosaic_0001>

<bundles_post_ra>
// kernel: tpu_custom_call.1
= control target key start
LH: loop header
LB: loop body
LE: loop exit
PB: predicated region body
PF: predicated region fallthrough
CT: control target
= control target key end

     0   :  { %6 = vsyncpa [#allocation4], 0  ;;  %s137_s0 = inlined_call_operand.hbm [shape: f32[16,128], index: 0, kind: input, shape index: {}]   ;;  %s138_s1 = inlined_call_operand.hbm [shape: f32[1,1], index: 1, kind: output, shape index: {}]  }
   0x1   :  { %7 = vsyncpa [#allocation5], 0  ;;  %s117_s6 = smov [#allocation3]  }
   0x2   :  { %s17_s7 = sshll.u32 %s117_s6, 4  ;;  %s18_s7 = int_to_ptr.vmem [resolvable:$true] %s17_s7 }
   0x3   :  { %s93_s8 = scalar_lea.vmem %s18_s7, 256  ;;  %p98_p1 = scmp.lt.s32.totalorder %s18_s7, %s18_s7 }
   0x4   :  { %p94_p0 = scmp.ne.s32.totalorder %s18_s7, %s93_s8  ;;  %p99_p2 = scmp.lt.s32.totalorder %s93_s8, %s93_s8 }
   0x6   :  { %p100_p3 = por %p99_p2, %p98_p1 }
   0x8   :  { %p101_p4 = pnand %p100_p3, %p94_p0 }
   0xa   :  { %104 = shalt.err (!%p101_p4)
}
   0xb   :  { %s118_s9 = smov 128   ;;  %s119_s10 = smov 8  }
   0xc   :  { %23 = dma.hbm_to_vmem [thread:$0]  %s137_s0, 256, %s18_s7, [#allocation4], %s118_s9, %s118_s9, %s119_s10  }
   0xd   :  { %113 = dma.done.wait [#allocation4], 256  }
   0xe   :  { %114 = vsyncadd [#allocation4], 4294967040  ;;  %v34_v0 = vld [vmem:[#allocation3] sm:$0xff]  ;;  %v35_v1 = vld [vmem:[#allocation3 + $0x8] sm:$0xff]  ;;  %s120_s13 = smov [#allocation6]  }
   0xf   :  { %vm36_vm0 = vcmp.ge.f32.partialorder %v34_v0, 0.5  ;;  %vm37_vm1 = vcmp.ge.f32.partialorder %v35_v1, 0.5  ;;  %v77_v2 = vadd.f32 -1.0, %v34_v0  ;;  %v78_v3 = vadd.f32 -1.0, %v35_v1 }
  0x11   :  { %v40_v4 = vsel %vm36_vm0, %v77_v2, %v34_v0  ;;  %v41_v5 = vsel %vm37_vm1, %v78_v3, %v35_v1 }
  0x12   :  { %v42_v6 = vmul.f32 %v40_v4, %v40_v4  ;;  %v43_v7 = vmul.f32 %v41_v5, %v41_v5 }
  0x14   :  { %v45_v8 = vadd.f32 %v43_v7, %v42_v6 }
  0x16   :  { %52 = vadd.xlane.f32.xlu0 %v45_v8 }
  0x9f   :  { %v53_v9 = vpop.xlane.xlu0 %52 }
  0xa0   :  { %v54_v10 = vrot.slane %v53_v9, 4 }
  0xa2   :  { %v55_v11 = vadd.f32 %v54_v10, %v53_v9 }
  0xa4   :  { %v56_v12 = vrot.slane %v55_v11, 2 }
  0xa6   :  { %v57_v13 = vadd.f32 %v56_v12, %v55_v11 }
  0xa8   :  { %v58_v14 = vrot.slane %v57_v13, 1 }
  0xaa   :  { %v59_v15 = vadd.f32 %v58_v14, %v57_v13 }
  0xac   :  { %79 = vpush %v59_v15 }
  0xdd   :  { %s80_s0 = spop %79 }
  0xde   :  { %62 = sst [smem:[#allocation6]] %s80_s0 }
  0xdf   :  { %70 = dma.smem_to_hbm %s120_s13, 16, %s138_s1, [#allocation5]  }
  0xe0   :  { %115 = dma.done.wait [#allocation5], 16  }
  0xe1   :  { %116 = vsyncadd [#allocation5], 4294967280 }
  0xe2   :  { %74 = sfence }
  0xe3   :  { %75 = vsyncpa [#allocation4], 1 }
  0xe4   :  { %76 = vsyncpa [#allocation5], 1 }

</bundles_post_ra>
